<compile_context>
chip_gen: v7x
topology: tpu7x:2x2x1
jax: 0.10.0
libtpu: 0.0.40
codegen_flags: <defaults>
</compile_context>

<pallas_src>
import jax
import jax.numpy as jnp
from jax.experimental import pallas as pl
from jax.experimental.pallas import tpu as pltpu

IN_DIM = 2
HIDDEN = 100
OUT_DIM = 2

H_PAD = 128      # hidden padded to one full lane width
OUT_PAD = 8      # output padded only to 8 cols (narrow, lane-dim == array dim)
SLAB_W = 8       # packed input slab: [x0, x1, t, 0, 0, 0, 0, 0]


def _round_up(n, m):
    return ((n + m - 1) // m) * m


def dummy_net_kernel(slab_ref, w1_ref, b1_ref, temb_ref,
                     w2_ref, b2_ref, w3_ref, b3_ref, o_ref):
    # unpack the lane-packed input slab
    x0 = slab_ref[:, 0:1]   # (Bt, 1)
    x1 = slab_ref[:, 1:2]   # (Bt, 1)
    tt = slab_ref[:, 2:3]   # (Bt, 1)

    # Layer 1 on the VPU (K=2 matmul would waste the MXU): two broadcast FMAs.
    h1 = x0 * w1_ref[0:1, :] + x1 * w1_ref[1:2, :] + b1_ref[...]
    h1 = jnp.maximum(h1, 0.0) + tt * temb_ref[...]            # (Bt, 128)

    # Layer 2 on the MXU: (Bt,128) @ (128,128), f32 accumulate.
    h2 = jnp.dot(h1, w2_ref[...], preferred_element_type=jnp.float32)
    h2 = jnp.maximum(h2 + b2_ref[...], 0.0)                    # (Bt, 128)

    # Layer 3 on the MXU with a narrow (8-col) padded output.
    out = jnp.dot(h2, w3_ref[...], preferred_element_type=jnp.float32)
    o_ref[...] = (out + b3_ref[...]).astype(o_ref.dtype)       # (Bt, 8)


def pad_params(params):
    """One-time zero-padding of the parameters (exact: relu(0)=0, zero
    rows/cols contribute nothing).  Call once, reuse across forward calls."""
    w1, b1, w2, b2, w3, b3, t_embed = params
    w1p = jnp.zeros((SLAB_W, H_PAD), jnp.float32).at[:IN_DIM, :HIDDEN].set(w1)
    b1p = jnp.zeros((1, H_PAD), jnp.float32).at[0, :HIDDEN].set(b1)
    tep = jnp.zeros((1, H_PAD), jnp.float32).at[0, :HIDDEN].set(t_embed)
    w2p = jnp.zeros((H_PAD, H_PAD), jnp.float32).at[:HIDDEN, :HIDDEN].set(w2)
    b2p = jnp.zeros((1, H_PAD), jnp.float32).at[0, :HIDDEN].set(b2)
    w3p = jnp.zeros((H_PAD, OUT_PAD), jnp.float32).at[:HIDDEN, :OUT_DIM].set(w3)
    b3p = jnp.zeros((1, OUT_PAD), jnp.float32).at[0, :OUT_DIM].set(b3)
    return (w1p, b1p, tep, w2p, b2p, w3p, b3p)


def dummy_net_forward(x, t, padded_params, block_b=2048):
    """x: (B, 2) f32, t: (B,) f32, padded_params from pad_params().
    Returns (B, 2) f32."""
    w1p, b1p, tep, w2p, b2p, w3p, b3p = padded_params
    B = x.shape[0]

    # Batch tile: multiple of 8 (sublane), large enough to amortize per-step
    # overhead, but capped at half the padded batch so the grid has >= 2 steps
    # whenever possible (v7x has 2 TensorCores sharding the "parallel" axis).
    B8 = _round_up(B, 8)
    half = _round_up((B8 + 1) // 2, 8)
    Bt = max(8, min(block_b, half, B8))
    B_pad = _round_up(B, Bt)

    # Lane-packed input slab: columns [x0, x1, t, 0...]; one concat + one pad.
    slab = jnp.concatenate([x, t[:, None]], axis=1)            # (B, 3)
    slab = jnp.pad(slab, ((0, B_pad - B), (0, SLAB_W - (IN_DIM + 1))))

    grid = (B_pad // Bt,)
    const = lambda shape: pl.BlockSpec(shape, lambda i: (0, 0))

    out_padded = pl.pallas_call(
        dummy_net_kernel,
        out_shape=jax.ShapeDtypeStruct((B_pad, OUT_PAD), jnp.float32),
        grid=grid,
        in_specs=[
            pl.BlockSpec((Bt, SLAB_W), lambda i: (i, 0)),   # packed x/t slab
            const((SLAB_W, H_PAD)),                         # W1 padded
            const((1, H_PAD)),                              # b1 padded
            const((1, H_PAD)),                              # t_embed padded
            const((H_PAD, H_PAD)),                          # W2 padded
            const((1, H_PAD)),                              # b2 padded
            const((H_PAD, OUT_PAD)),                        # W3 padded (128, 8)
            const((1, OUT_PAD)),                            # b3 padded (1, 8)
        ],
        out_specs=pl.BlockSpec((Bt, OUT_PAD), lambda i: (i, 0)),
        compiler_params=pltpu.CompilerParams(
            dimension_semantics=("parallel",)),
    )(slab, w1p, b1p, tep, w2p, b2p, w3p, b3p)

    return out_padded[:B, :OUT_DIM]


def init_params(key):
    """Deterministic parameter init matching the shapes of DummyNet.__init__."""
    ks = jax.random.split(key, 7)
    # nn.Linear-style: weight [out, in] -> stored transposed as [in, out]
    def linear(kw, kb, fan_in, fan_out):
        bound = 1.0 / jnp.sqrt(fan_in)
        w = jax.random.uniform(kw, (fan_in, fan_out), jnp.float32, -bound, bound)
        b = jax.random.uniform(kb, (fan_out,), jnp.float32, -bound, bound)
        return w, b

    w1, b1 = linear(ks[0], ks[1], IN_DIM, HIDDEN)
    w2, b2 = linear(ks[2], ks[3], HIDDEN, HIDDEN)
    w3, b3 = linear(ks[4], ks[5], HIDDEN, OUT_DIM)
    t_embed = jax.random.normal(ks[6], (HIDDEN,), jnp.float32)
    return (w1, b1, w2, b2, w3, b3, t_embed)


def reference_forward(x, t, params):
    """Pure-JAX reference of the PyTorch forward (for correctness check)."""
    w1, b1, w2, b2, w3, b3, t_embed = params
    te = t[:, None] * t_embed[None, :]
    h = jnp.maximum(x @ w1 + b1, 0.0) + te
    h = jnp.maximum(h @ w2 + b2, 0.0)
    return h @ w3 + b3


if __name__ == "__main__":
    key = jax.random.PRNGKey(0)
    k_params, k_x, k_t = jax.random.split(key, 3)

    params = init_params(k_params)
    padded_params = pad_params(params)   # hoisted: pad weights once

    B = 8
    x = jax.random.normal(k_x, (B, IN_DIM), jnp.float32)
    t = jax.random.uniform(k_t, (B,), jnp.float32)

    out = dummy_net_forward(x, t, padded_params)
    out = jax.block_until_ready(out)

    ref = reference_forward(x, t, params)
    assert out.shape == (B, OUT_DIM)
    assert jnp.allclose(out, ref, atol=1e-4, rtol=1e-4), "mismatch vs reference"

    # Also exercise a multi-step grid (>= 2 steps, exercises batch tiling path).
    B2 = 4096
    k_x2, k_t2 = jax.random.split(k_x)
    x2 = jax.random.normal(k_x2, (B2, IN_DIM), jnp.float32)
    t2 = jax.random.uniform(k_t2, (B2,), jnp.float32)
    out2 = jax.block_until_ready(dummy_net_forward(x2, t2, padded_params))
    ref2 = reference_forward(x2, t2, params)
    assert out2.shape == (B2, OUT_DIM)
    assert jnp.allclose(out2, ref2, atol=1e-4, rtol=1e-4), "mismatch vs reference (large)"

    print("KERNEL_OK")
</pallas_src>

<mosaic_0001>
module attributes {stable_mosaic.version = 11 : i64} {
  func.func @dummy_net_kernel(%arg0: i32, %arg1: memref<8x8xf32, #tpu.memory_space<vmem>>, %arg2: memref<8x128xf32, #tpu.memory_space<vmem>>, %arg3: memref<1x128xf32, #tpu.memory_space<vmem>>, %arg4: memref<1x128xf32, #tpu.memory_space<vmem>>, %arg5: memref<128x128xf32, #tpu.memory_space<vmem>>, %arg6: memref<1x128xf32, #tpu.memory_space<vmem>>, %arg7: memref<128x8xf32, #tpu.memory_space<vmem>>, %arg8: memref<1x8xf32, #tpu.memory_space<vmem>>, %arg9: memref<8x8xf32, #tpu.memory_space<vmem>>) attributes {dimension_semantics = [#tpu.dimension_semantics<parallel>], iteration_bounds = array<i64: 1>, scalar_prefetch = 0 : i64, scratch_operands = 0 : i64, tpu.core_type = #tpu.core_type<tc>, window_params = [{transform_indices = @transform_0, window_bounds = array<i64: 8, 8>}, {pipeline_mode = #tpu.pipeline_mode<synchronous>, transform_indices = @transform_1, window_bounds = array<i64: 8, 128>}, {pipeline_mode = #tpu.pipeline_mode<synchronous>, transform_indices = @transform_2, window_bounds = array<i64: 1, 128>}, {pipeline_mode = #tpu.pipeline_mode<synchronous>, transform_indices = @transform_3, window_bounds = array<i64: 1, 128>}, {pipeline_mode = #tpu.pipeline_mode<synchronous>, transform_indices = @transform_4, window_bounds = array<i64: 128, 128>}, {pipeline_mode = #tpu.pipeline_mode<synchronous>, transform_indices = @transform_5, window_bounds = array<i64: 1, 128>}, {pipeline_mode = #tpu.pipeline_mode<synchronous>, transform_indices = @transform_6, window_bounds = array<i64: 128, 8>}, {pipeline_mode = #tpu.pipeline_mode<synchronous>, transform_indices = @transform_7, window_bounds = array<i64: 1, 8>}, {transform_indices = @transform_8, window_bounds = array<i64: 8, 8>}]} {
    %c0 = arith.constant 0 : index
    %c0_0 = arith.constant 0 : index
    %0 = vector.load %arg1[%c0, %c0_0] : memref<8x8xf32, #tpu.memory_space<vmem>>, vector<8x1xf32>
    %c0_1 = arith.constant 0 : index
    %c1 = arith.constant 1 : index
    %1 = vector.load %arg1[%c0_1, %c1] : memref<8x8xf32, #tpu.memory_space<vmem>>, vector<8x1xf32>
    %c0_2 = arith.constant 0 : index
    %c2 = arith.constant 2 : index
    %2 = vector.load %arg1[%c0_2, %c2] : memref<8x8xf32, #tpu.memory_space<vmem>>, vector<8x1xf32>
    %c0_3 = arith.constant 0 : index
    %c0_4 = arith.constant 0 : index
    %3 = vector.load %arg2[%c0_3, %c0_4] : memref<8x128xf32, #tpu.memory_space<vmem>>, vector<1x128xf32>
    %4 = vector.broadcast %0 : vector<8x1xf32> to vector<8x128xf32>
    %5 = vector.broadcast %3 : vector<1x128xf32> to vector<8x128xf32>
    %6 = arith.mulf %4, %5 : vector<8x128xf32>
    %c1_5 = arith.constant 1 : index
    %c0_6 = arith.constant 0 : index
    %7 = vector.load %arg2[%c1_5, %c0_6] : memref<8x128xf32, #tpu.memory_space<vmem>>, vector<1x128xf32>
    %8 = vector.broadcast %1 : vector<8x1xf32> to vector<8x128xf32>
    %9 = vector.broadcast %7 : vector<1x128xf32> to vector<8x128xf32>
    %10 = arith.mulf %8, %9 : vector<8x128xf32>
    %11 = arith.addf %6, %10 : vector<8x128xf32>
    %c0_7 = arith.constant 0 : index
    %c0_8 = arith.constant 0 : index
    %12 = vector.load %arg3[%c0_7, %c0_8] : memref<1x128xf32, #tpu.memory_space<vmem>>, vector<1x128xf32>
    %13 = vector.broadcast %12 : vector<1x128xf32> to vector<8x128xf32>
    %14 = arith.addf %11, %13 : vector<8x128xf32>
    %cst = arith.constant 0.000000e+00 : f32
    %15 = vector.broadcast %cst : f32 to vector<8x128xf32>
    %16 = arith.maximumf %14, %15 : vector<8x128xf32>
    %c0_9 = arith.constant 0 : index
    %c0_10 = arith.constant 0 : index
    %17 = vector.load %arg4[%c0_9, %c0_10] : memref<1x128xf32, #tpu.memory_space<vmem>>, vector<1x128xf32>
    %18 = vector.broadcast %2 : vector<8x1xf32> to vector<8x128xf32>
    %19 = vector.broadcast %17 : vector<1x128xf32> to vector<8x128xf32>
    %20 = arith.mulf %18, %19 : vector<8x128xf32>
    %21 = arith.addf %16, %20 : vector<8x128xf32>
    %c0_11 = arith.constant 0 : index
    %c0_12 = arith.constant 0 : index
    %22 = vector.load %arg5[%c0_11, %c0_12] : memref<128x128xf32, #tpu.memory_space<vmem>>, vector<128x128xf32>
    %cst_13 = arith.constant dense<0.000000e+00> : vector<8x128xf32>
    %23 = tpu.matmul %21, %22, %cst_13 {dimension_numbers = #tpu.dot_dimension_numbers<[1], [0], [0], [1], [0, 0, 1, 1], [], []>} : vector<8x128xf32>, vector<128x128xf32>, vector<8x128xf32> -> vector<8x128xf32>
    %c0_14 = arith.constant 0 : index
    %c0_15 = arith.constant 0 : index
    %24 = vector.load %arg6[%c0_14, %c0_15] : memref<1x128xf32, #tpu.memory_space<vmem>>, vector<1x128xf32>
    %25 = vector.broadcast %24 : vector<1x128xf32> to vector<8x128xf32>
    %26 = arith.addf %23, %25 : vector<8x128xf32>
    %cst_16 = arith.constant 0.000000e+00 : f32
    %27 = vector.broadcast %cst_16 : f32 to vector<8x128xf32>
    %28 = arith.maximumf %26, %27 : vector<8x128xf32>
    %c0_17 = arith.constant 0 : index
    %c0_18 = arith.constant 0 : index
    %29 = vector.load %arg7[%c0_17, %c0_18] : memref<128x8xf32, #tpu.memory_space<vmem>>, vector<128x8xf32>
    %cst_19 = arith.constant dense<0.000000e+00> : vector<8x8xf32>
    %30 = tpu.matmul %28, %29, %cst_19 {dimension_numbers = #tpu.dot_dimension_numbers<[1], [0], [0], [1], [0, 0, 1, 1], [], []>} : vector<8x128xf32>, vector<128x8xf32>, vector<8x8xf32> -> vector<8x8xf32>
    %c0_20 = arith.constant 0 : index
    %c0_21 = arith.constant 0 : index
    %31 = vector.load %arg8[%c0_20, %c0_21] : memref<1x8xf32, #tpu.memory_space<vmem>>, vector<1x8xf32>
    %32 = vector.broadcast %31 : vector<1x8xf32> to vector<8x8xf32>
    %33 = arith.addf %30, %32 : vector<8x8xf32>
    %c0_22 = arith.constant 0 : index
    %c0_23 = arith.constant 0 : index
    %34 = vector.load %arg9[%c0_22, %c0_23] : memref<8x8xf32, #tpu.memory_space<vmem>>, vector<8x8xf32>
    tpu.vector_store %arg9[%c0_22, %c0_23], %33 {strides = array<i32>} : memref<8x8xf32, #tpu.memory_space<vmem>>, vector<8x8xf32>,
    return
  }
  func.func @transform_0(%arg0: i32) -> (i32, i32) {
    %c0_i32 = arith.constant 0 : i32
    %c0_i32_0 = arith.constant 0 : i32
    return %arg0, %c0_i32 : i32, i32
  }
  func.func @transform_1(%arg0: i32) -> (i32, i32) {
    %c0_i32 = arith.constant 0 : i32
    %c0_i32_0 = arith.constant 0 : i32
    %c0_i32_1 = arith.constant 0 : i32
    return %c0_i32, %c0_i32_0 : i32, i32
  }
  func.func @transform_2(%arg0: i32) -> (i32, i32) {
    %c0_i32 = arith.constant 0 : i32
    %c0_i32_0 = arith.constant 0 : i32
    %c0_i32_1 = arith.constant 0 : i32
    return %c0_i32, %c0_i32_0 : i32, i32
  }
  func.func @transform_3(%arg0: i32) -> (i32, i32) {
    %c0_i32 = arith.constant 0 : i32
    %c0_i32_0 = arith.constant 0 : i32
    %c0_i32_1 = arith.constant 0 : i32
    return %c0_i32, %c0_i32_0 : i32, i32
  }
  func.func @transform_4(%arg0: i32) -> (i32, i32) {
    %c0_i32 = arith.constant 0 : i32
    %c0_i32_0 = arith.constant 0 : i32
    %c0_i32_1 = arith.constant 0 : i32
    return %c0_i32, %c0_i32_0 : i32, i32
  }
  func.func @transform_5(%arg0: i32) -> (i32, i32) {
    %c0_i32 = arith.constant 0 : i32
    %c0_i32_0 = arith.constant 0 : i32
    %c0_i32_1 = arith.constant 0 : i32
    return %c0_i32, %c0_i32_0 : i32, i32
  }
  func.func @transform_6(%arg0: i32) -> (i32, i32) {
    %c0_i32 = arith.constant 0 : i32
    %c0_i32_0 = arith.constant 0 : i32
    %c0_i32_1 = arith.constant 0 : i32
    return %c0_i32, %c0_i32_0 : i32, i32
  }
  func.func @transform_7(%arg0: i32) -> (i32, i32) {
    %c0_i32 = arith.constant 0 : i32
    %c0_i32_0 = arith.constant 0 : i32
    %c0_i32_1 = arith.constant 0 : i32
    return %c0_i32, %c0_i32_0 : i32, i32
  }
  func.func @transform_8(%arg0: i32) -> (i32, i32) {
    %c0_i32 = arith.constant 0 : i32
    %c0_i32_0 = arith.constant 0 : i32
    return %arg0, %c0_i32 : i32, i32
  }
}

</mosaic_0001>

<bundles_post_ra>
// kernel: tpu_custom_call.1
= control target key start
LH: loop header
LB: loop body
LE: loop exit
PB: predicated region body
PF: predicated region fallthrough
CT: control target
= control target key end

     0   :  { %13 = vsyncpa [#allocation3], 0  ;;  %s716_s0 = inlined_call_operand.vmem [shape: f32[8,8], index: 0, kind: input, shape index: {}]   ;;  %s717_s1 = inlined_call_operand.vmem [shape: f32[8,128], index: 1, kind: input, shape index: {}]   ;;  %s718_s2 = inlined_call_operand.vmem [shape: f32[1,128], index: 2, kind: input, shape index: {}]   ;;  %s719_s3 = inlined_call_operand.vmem [shape: f32[1,128], index: 3, kind: input, shape index: {}]   ;;  %s720_s4 = inlined_call_operand.vmem [shape: f32[128,128], index: 4, kind: input, shape index: {}]   ;;  %s721_s5 = inlined_call_operand.hbm [shape: f32[1,128], index: 5, kind: input, shape index: {}]   ;;  %s722_s6 = inlined_call_operand.vmem [shape: f32[128,8], index: 6, kind: input, shape index: {}]   ;;  %s723_s7 = inlined_call_operand.vmem [shape: f32[1,8], index: 7, kind: input, shape index: {}]   ;;  %s724_s8 = inlined_call_operand.hbm [shape: f32[8,8], index: 8, kind: output, shape index: {}]  }
   0x1   :  { %14 = vsyncpa [#allocation4], 0  ;;  %s509_s27 = smov [#allocation2]   ;;  %s461_s9 = scalar_lea.hbm %s721_s5, 16 }
   0x2   :  { %s31_s28 = sshll.u32 %s509_s27, 4  ;;  %p462_p0 = scmp.ne.s32.totalorder %s721_s5, %s461_s9  ;;  %s32_s28 = int_to_ptr.vmem [resolvable:$true] %s31_s28 }
   0x3   :  { %p465_p1 = scmp.lt.u32.totalorder %s461_s9, %s721_s5 }
   0x5   :  { %p467_p2 = pnand %p465_p1, %p462_p0 }
   0x7   :  { %470 = shalt.err (!%p467_p2)
}
   0x8   :  { %s471_s14 = scalar_lea.vmem %s32_s28, 16  ;;  %s475_s15 = scalar_lea.vmem %s32_s28, 32 }
   0x9   :  { %p472_p3 = scmp.ne.s32.totalorder %s32_s28, %s471_s14  ;;  %p476_p4 = scmp.lt.s32.totalorder %s32_s28, %s32_s28 }
   0xa   :  { %p477_p5 = scmp.lt.s32.totalorder %s475_s15, %s471_s14 }
   0xc   :  { %p478_p6 = por %p477_p5, %p476_p4 }
   0xe   :  { %p479_p7 = pnand %p478_p6, %p472_p3 }
  0x10   :  { %482 = shalt.err (!%p479_p7)
}
  0x11   :  { %34 = dma.hbm_to_vmem [thread:$0]  %s721_s5, 16, %s32_s28, [#allocation3]  }
  0x12   :  { %505 = dma.done.wait [#allocation3], 16  }
  0x13   :  { %506 = vsyncadd [#allocation3], 4294967280  ;;  %v510_v0 = vmov 0   ;;  %v511_v1 = vmov 2   ;;  %v512_v2 = vmov 0.0|0.0   ;;  %v42_v3 = vld [vmem:[%s716_s0] sm:$0xff] }
  0x14   :  { %457 = vset.pattern.permute.xlu0 %v510_v0  ;;  %459 = vset.pattern.permute.xlu1 %v511_v1  ;;  %v87_v4 = vld [vmem:[%s720_s4] sm:$0xff]  ;;  %v88_v5 = vld [vmem:[%s720_s4 + $0x8] sm:$0xff]  ;;  %v89_v7 = vld [vmem:[%s720_s4 + $0x10] sm:$0xff]  ;;  %v513_v12 = vmov 1   ;;  %vm514_vm0 = vmmov 0   ;;  %v515_v22 = vmov 0.0  }
  0x15   :  { %401 = vmatprep.subr.bf16.mxu0 %v512_v2  ;;  %425 = vmatprep.subr.bf16.mxu1 %v512_v2  ;;  %v402_v6 = vpack.c.bf16 %v88_v5, %v87_v4  ;;  %v90_v8 = vld [vmem:[%s720_s4 + $0x18] sm:$0xff]  ;;  %v91_v10 = vld [vmem:[%s720_s4 + $0x20] sm:$0xff]  ;;  %v92_v11 = vld [vmem:[%s720_s4 + $0x28] sm:$0xff]  ;;  %s516_s18 = smov [#allocation5]   ;;  %vm274_vm1 = vcmask 64512  }
  0x16   :  { %46 = vperm.xlu0 %457, %v42_v3   ;;  %76 = vperm.xlu1 %459, %v42_v3   ;;  %v405_v9 = vpack.c.bf16 %v90_v8, %v89_v7  ;;  %v408_v13 = vpack.c.bf16 %v92_v11, %v91_v10  ;;  %v93_v14 = vld [vmem:[%s720_s4 + $0x30] sm:$0xff]  ;;  %v94_v15 = vld [vmem:[%s720_s4 + $0x38] sm:$0xff]  ;;  %v95_v17 = vld [vmem:[%s720_s4 + $0x40] sm:$0xff]  ;;  %s282_s19 = sshll.u32 %s516_s18, 4  ;;  %s283_s19 = int_to_ptr.vmem [resolvable:$true] %s282_s19 }
  0x17   :  { %403 = vmatpush3.bf16.msra.mxu0 %v402_v6  ;;  %v411_v16 = vpack.c.bf16 %v94_v15, %v93_v14  ;;  %v96_v18 = vld [vmem:[%s720_s4 + $0x48] sm:$0xff]  ;;  %v97_v20 = vld [vmem:[%s720_s4 + $0x50] sm:$0xff]  ;;  %v98_v21 = vld [vmem:[%s720_s4 + $0x58] sm:$0xff]  ;;  %363 = vmatprep.mubr.msk.f32.mxu0 %vm514_vm0, %v515_v22  ;;  %p488_p9 = scmp.lt.s32.totalorder %s283_s19, %s283_s19 }
  0x18   :  { %404 = vmatprep.subr.bf16.mxu0 %v512_v2  ;;  %v414_v19 = vpack.c.bf16 %v96_v18, %v95_v17  ;;  %v181_v23 = vld [vmem:[%s722_s6] sm:$0xff]  ;;  %v182_v24 = vld [vmem:[%s722_s6 + $0x8] sm:$0xff]  ;;  %v183_v25 = vld [vmem:[%s722_s6 + $0x10] sm:$0xff]  ;;  %398 = vmatprep.mubr.msk.f32.mxu1 %vm514_vm0, %v515_v22  ;;  %v417_v28 = vpack.c.bf16 %v98_v21, %v97_v20 }
  0x19   :  { %v426_v26 = vpack.c.bf16 %v182_v24, %v181_v23  ;;  %v184_v27 = vld [vmem:[%s722_s6 + $0x18] sm:$0xff]  ;;  %v99_v29 = vld [vmem:[%s720_s4 + $0x60] sm:$0xff]  ;;  %v100_v31 = vld [vmem:[%s720_s4 + $0x68] sm:$0xff] }
  0x1a   :  { %458 = vset.pattern.permute.xlu0 %v513_v12  ;;  %v429_v30 = vpack.c.bf16 %v184_v27, %v183_v25  ;;  %v185_v32 = vld [vmem:[%s722_s6 + $0x20] sm:$0xff]  ;;  %v186_v33 = vld [vmem:[%s722_s6 + $0x28] sm:$0xff]  ;;  %v420_v34 = vpack.c.bf16 %v100_v31, %v99_v29  ;;  %v101_v35 = vld [vmem:[%s720_s4 + $0x70] sm:$0xff] }
  0x1b   :  { %56 = vperm.xlu0 %458, %v42_v3   ;;  %406 = vmatpush3.bf16.msra.mxu0 %v405_v9  ;;  %v432_v36 = vpack.c.bf16 %v186_v33, %v185_v32  ;;  %v102_v37 = vld [vmem:[%s720_s4 + $0x78] sm:$0xff]  ;;  %v187_v38 = vld [vmem:[%s722_s6 + $0x30] sm:$0xff]  ;;  %v189_v42 = vld [vmem:[%s722_s6 + $0x40] sm:$0xff] }
  0x1c   :  { %407 = vmatprep.subr.bf16.mxu0 %v512_v2  ;;  %427 = vmatpush3.bf16.msra.mxu1 %v426_v26  ;;  %v188_v39 = vld [vmem:[%s722_s6 + $0x38] sm:$0xff]  ;;  %v423_v40 = vpack.c.bf16 %v102_v37, %v101_v35  ;;  %v190_v43 = vld [vmem:[%s722_s6 + $0x48] sm:$0xff]  ;;  %v191_v45 = vld [vmem:[%s722_s6 + $0x50] sm:$0xff] }
  0x1d   :  { %428 = vmatprep.subr.bf16.mxu1 %v512_v2  ;;  %v435_v41 = vpack.c.bf16 %v188_v39, %v187_v38  ;;  %v438_v44 = vpack.c.bf16 %v190_v43, %v189_v42  ;;  %v192_v46 = vld [vmem:[%s722_s6 + $0x58] sm:$0xff]  ;;  %v193_v48 = vld [vmem:[%s722_s6 + $0x60] sm:$0xff]  ;;  %v194_v49 = vld [vmem:[%s722_s6 + $0x68] sm:$0xff] }
  0x1e   :  { %v441_v47 = vpack.c.bf16 %v192_v46, %v191_v45  ;;  %v444_v50 = vpack.c.bf16 %v194_v49, %v193_v48  ;;  %v291_v52 = vld [vmem:[%s717_s1] ss:$0 sm:$0xff]  ;;  %v292_v53 = vld [vmem:[%s717_s1 + $0x1] ss:$0 sm:$0xff] }
  0x1f   :  { %460 = vset.pattern.permute.xlu0 %v511_v1  ;;  %409 = vmatpush3.bf16.msra.mxu0 %v408_v13  ;;  %v293_v57 = vld [vmem:[%s718_s2] ss:$0 sm:$0xff]  ;;  %v195_v1 = vld [vmem:[%s722_s6 + $0x70] sm:$0xff] }
  0x20   :  { %410 = vmatprep.subr.bf16.mxu0 %v512_v2  ;;  %430 = vmatpush3.bf16.msra.mxu1 %v429_v30  ;;  %v294_v58 = vld [vmem:[%s719_s3] ss:$0 sm:$0xff] }
  0x21   :  { %431 = vmatprep.subr.bf16.mxu1 %v512_v2  ;;  %v295_v4 = vld [vmem:[#allocation2] ss:$0 sm:$0xff] }
  0x22   :  { %v296_v9 = vld [vmem:[%s723_s7] ss:$0 sm:$0xff] }
  0x23   :  { %412 = vmatpush3.bf16.msra.mxu0 %v411_v16 }
  0x24   :  { %413 = vmatprep.subr.bf16.mxu0 %v512_v2  ;;  %433 = vmatpush3.bf16.msra.mxu1 %v432_v36 }
  0x25   :  { %434 = vmatprep.subr.bf16.mxu1 %v512_v2 }
  0x27   :  { %415 = vmatpush3.bf16.msra.mxu0 %v414_v19 }
  0x28   :  { %416 = vmatprep.subr.bf16.mxu0 %v512_v2  ;;  %436 = vmatpush3.bf16.msra.mxu1 %v435_v41 }
  0x29   :  { %437 = vmatprep.subr.bf16.mxu1 %v512_v2 }
  0x2b   :  { %418 = vmatpush3.bf16.msra.mxu0 %v417_v28 }
  0x2c   :  { %419 = vmatprep.subr.bf16.mxu0 %v512_v2  ;;  %439 = vmatpush3.bf16.msra.mxu1 %v438_v44 }
  0x2d   :  { %440 = vmatprep.subr.bf16.mxu1 %v512_v2 }
  0x2f   :  { %421 = vmatpush3.bf16.msra.mxu0 %v420_v34 }
  0x30   :  { %422 = vmatprep.subr.bf16.mxu0 %v512_v2  ;;  %442 = vmatpush3.bf16.msra.mxu1 %v441_v47 }
  0x31   :  { %443 = vmatprep.subr.bf16.mxu1 %v512_v2 }
  0x33   :  { %424 = vmatpush3.bf16.msra.mxu0 %v423_v40 }
  0x34   :  { %445 = vmatpush3.bf16.msra.mxu1 %v444_v50 }
  0x35   :  { %446 = vmatprep.subr.bf16.mxu1 %v512_v2  ;;  %v196_v2 = vld [vmem:[%s722_s6 + $0x78] sm:$0xff]  ;;  %s483_s6 = scalar_lea.vmem %s283_s19, 128 }
  0x36   :  { %v447_v3 = vpack.c.bf16 %v196_v2, %v195_v1  ;;  %p484_p8 = scmp.ne.s32.totalorder %s283_s19, %s483_s6  ;;  %p489_p10 = scmp.lt.s32.totalorder %s483_s6, %s483_s6 }
  0x38   :  { %448 = vmatpush3.bf16.msra.mxu1 %v447_v3  ;;  %p490_p11 = por %p489_p10, %p488_p9 }
  0x3a   :  { %p491_p12 = pnand %p490_p11, %p484_p8 }
  0x95   :  { %v47_v51 = vpop.permute.xlu0 %46  ;;  %v77_v59 = vpop.permute.xlu1 %76 }
  0x96   :  { %v53_v55 = vmul.f32 %v291_v52, %v47_v51  ;;  %v85_v62 = vmul.f32 %v294_v58, %v77_v59 }
  0x9a   :  { %v57_v54 = vpop.permute.xlu0 %56 }
  0x9b   :  { %v63_v56 = vmul.f32 %v292_v53, %v57_v54 }
  0x9d   :  { %v64_v60 = vadd.f32 %v63_v56, %v53_v55 }
  0x9f   :  { %v72_v61 = vadd.f32 %v293_v57, %v64_v60 }
  0xa1   :  { %v73_v63 = vmax.f32 %v72_v61, 0.0 }
  0xa3   :  { %v86_v0 = vadd.f32 %v85_v62, %v73_v63 }
  0xa5   :  { %364 = vmatmul.mubr.f32.vlgmr.msra.gmra.mrb[0].mxu0 %v86_v0 }
 0x178   :  { %v176_v5 = vpop.f32.mrb[0].mxu0 }
 0x179   :  { %v177_v6 = vadd.f32 %v295_v4, %v176_v5  ;;  %v365_v7 = vpop.f32.mrb[1].mxu0 }
 0x17b   :  { %v180_v8 = vmax.f32 %v177_v6, 0.0 }
 0x17d   :  { %399 = vmatmul.mubr.f32.vlgmr.msra.gmra.mrb[0].mxu1 %v180_v8 }
 0x250   :  { %v270_v10 = vpop.f32.mrb[0].mxu1 }
 0x251   :  { %v271_v11 = vadd.f32 %v296_v9, %v270_v10  ;;  %v400_v12 = vpop.f32.mrb[1].mxu1 }
 0x253   :  { %275 = vst.msk [vmem:[#allocation5] sm:$0xff] %vm274_vm1, %v271_v11 }
 0x254   :  { %494 = shalt.err (!%p491_p12)
}
 0x255   :  { %s495_s21 = scalar_lea.hbm %s724_s8, 128 }
 0x256   :  { %p496_p13 = scmp.ne.s32.totalorder %s724_s8, %s495_s21  ;;  %p499_p0 = scmp.lt.u32.totalorder %s495_s21, %s724_s8 }
 0x258   :  { %p501_p1 = pnand %p499_p0, %p496_p13 }
 0x25a   :  { %504 = shalt.err (!%p501_p1)
}
 0x25b   :  { %285 = dma.vmem_to_hbm [thread:$0]  %s283_s19, 128, %s724_s8, [#allocation4]  }
 0x25c   :  { %507 = dma.done.wait [#allocation4], 128  }
 0x25d   :  { %508 = vsyncadd [#allocation4], 4294967168 }
 0x25e   :  { %289 = vsyncpa [#allocation3], 1 }
 0x25f   :  { %290 = vsyncpa [#allocation4], 1 }

</bundles_post_ra>
